<compile_context>
chip_gen: v5e
topology: v5e:2x2
jax: 0.10.0
libtpu: 0.0.40
codegen_flags: <defaults>
</compile_context>

<pallas_src>
import jax
import jax.numpy as jnp
from jax.experimental import pallas as pl
from jax.experimental.pallas import tpu as pltpu


def _sigmoid_kernel(x_ref, o_ref):
    x = x_ref[...]
    # Reference semantics: clip to [-100, 1e10] before sigmoid.
    z = jnp.clip(x, -100.0, 1e10)
    o_ref[...] = 1.0 / (1.0 + jnp.exp(-z))


def sigmoid_pallas(x, *, lane=1024, tile_rows_max=512):
    """Elementwise sigmoid via a lane-dense, tiled Pallas kernel."""
    orig_shape = x.shape
    total = x.size

    # Flatten and pad up to a whole number of lane-dense rows.
    rows = -(-total // lane)  # ceil div
    if rows > tile_rows_max:
        # Tile the row axis; pad rows up to a multiple of the tile height
        # (tile_rows_max is a multiple of 8, lane is a multiple of 128).
        rows = -(-rows // tile_rows_max) * tile_rows_max
        tile_rows = tile_rows_max
    else:
        # Single tile covering the full (small) array — full-extent block is
        # exempt from the (8, 128) divisibility requirement.
        tile_rows = rows

    padded = rows * lane
    flat = x.reshape(-1)
    if padded != total:
        flat = jnp.pad(flat, (0, padded - total))
    x2d = flat.reshape(rows, lane)

    grid = (rows // tile_rows,)

    out2d = pl.pallas_call(
        _sigmoid_kernel,
        out_shape=jax.ShapeDtypeStruct((rows, lane), x.dtype),
        grid=grid,
        in_specs=[pl.BlockSpec((tile_rows, lane), lambda i: (i, 0))],
        out_specs=pl.BlockSpec((tile_rows, lane), lambda i: (i, 0)),
        compiler_params=pltpu.CompilerParams(
            dimension_semantics=("parallel",)
        ),
    )(x2d)

    return out2d.reshape(-1)[:total].reshape(orig_shape)


if __name__ == "__main__":
    key = jax.random.PRNGKey(0)
    x = jax.random.normal(key, (2, 4, 16, 16), dtype=jnp.float32) * 3.0

    out = sigmoid_pallas(x)
    jax.block_until_ready(out)

    # Pure-JAX reference of the same formula (module's sigmoid with clip).
    z = jnp.clip(x, -100.0, 1e10)
    ref = 1.0 / (1.0 + jnp.exp(-z))
    assert jnp.allclose(out, ref, atol=1e-6), "mismatch vs reference"

    print("KERNEL_OK")
</pallas_src>

<mosaic_0001>
module attributes {stable_mosaic.version = 11 : i64} {
  func.func @_sigmoid_kernel(%arg0: i32, %arg1: memref<2x1024xf32, #tpu.memory_space<vmem>>, %arg2: memref<2x1024xf32, #tpu.memory_space<vmem>>) attributes {dimension_semantics = [#tpu.dimension_semantics<parallel>], iteration_bounds = array<i64: 1>, scalar_prefetch = 0 : i64, scratch_operands = 0 : i64, tpu.core_type = #tpu.core_type<tc>, window_params = [{transform_indices = @transform_0, window_bounds = array<i64: 2, 1024>}, {transform_indices = @transform_1, window_bounds = array<i64: 2, 1024>}]} {
    %c0 = arith.constant 0 : index
    %c0_0 = arith.constant 0 : index
    %0 = vector.load %arg1[%c0, %c0_0] : memref<2x1024xf32, #tpu.memory_space<vmem>>, vector<2x1024xf32>
    %cst = arith.constant -1.000000e+02 : f32
    %cst_1 = arith.constant 1.000000e+10 : f32
    %1 = vector.broadcast %cst : f32 to vector<2x1024xf32>
    %2 = arith.maximumf %1, %0 : vector<2x1024xf32>
    %3 = vector.broadcast %cst_1 : f32 to vector<2x1024xf32>
    %4 = arith.minimumf %3, %2 : vector<2x1024xf32>
    %cst_2 = arith.constant 0.000000e+00 : f32
    %5 = vector.broadcast %cst_2 : f32 to vector<2x1024xf32>
    %6 = arith.subf %5, %4 : vector<2x1024xf32>
    %7 = math.exp %6 : vector<2x1024xf32>
    %cst_3 = arith.constant 1.000000e+00 : f32
    %8 = vector.broadcast %cst_3 : f32 to vector<2x1024xf32>
    %9 = arith.addf %8, %7 : vector<2x1024xf32>
    %cst_4 = arith.constant 1.000000e+00 : f32
    %10 = vector.broadcast %cst_4 : f32 to vector<2x1024xf32>
    %11 = arith.divf %10, %9 : vector<2x1024xf32>
    %c0_5 = arith.constant 0 : index
    %c0_6 = arith.constant 0 : index
    %12 = vector.load %arg2[%c0_5, %c0_6] : memref<2x1024xf32, #tpu.memory_space<vmem>>, vector<2x1024xf32>
    tpu.vector_store %arg2[%c0_5, %c0_6], %11 {strides = array<i32>} : memref<2x1024xf32, #tpu.memory_space<vmem>>, vector<2x1024xf32>,
    return
  }
  func.func @transform_0(%arg0: i32) -> (i32, i32) {
    %c0_i32 = arith.constant 0 : i32
    %c0_i32_0 = arith.constant 0 : i32
    return %arg0, %c0_i32 : i32, i32
  }
  func.func @transform_1(%arg0: i32) -> (i32, i32) {
    %c0_i32 = arith.constant 0 : i32
    %c0_i32_0 = arith.constant 0 : i32
    return %arg0, %c0_i32 : i32, i32
  }
}

</mosaic_0001>

<bundles_post_ra>
// kernel: tpu_custom_call.1
= control target key start
LH: loop header
LB: loop body
LE: loop exit
PB: predicated region body
PF: predicated region fallthrough
CT: control target
= control target key end

     0   :  { %6 = vsyncpa [#allocation3], 0  ;;  %s166_s0 = inlined_call_operand.hbm [shape: f32[2,1024], index: 0, kind: input, shape index: {}]   ;;  %s167_s1 = inlined_call_operand.hbm [shape: f32[2,1024], index: 1, kind: output, shape index: {}]  }
   0x1   :  { %7 = vsyncpa [#allocation4], 0  ;;  %s13_s8 = sshll.u32 %s166_s0, 4  ;;  %s148_s9 = smov [#allocation2]   ;;  %s14_s8 = int_to_ptr.hbm [resolvable:$true] %s13_s8 }
   0x2   :  { %s15_s10 = sshll.u32 %s148_s9, 4  ;;  %s16_s10 = int_to_ptr.vmem [resolvable:$true] %s15_s10 }
   0x3   :  { %18 = dma.hbm_to_vmem [thread:$0]  %s14_s8, 256, %s16_s10, [#allocation3]  }
   0x4   :  { %144 = dma.done.wait [#allocation3], 256  }
   0x5   :  { %145 = vsyncadd [#allocation3], 4294967040  ;;  %v23_v0 = vld [vmem:[#allocation2] sm:$0xff]  ;;  %v24_v1 = vld [vmem:[#allocation2 + $0x8] sm:$0xff]  ;;  %s149_s0 = smov [#allocation5]   ;;  %s76_s14 = sshll.u32 %s167_s1, 4  ;;  %s77_s14 = int_to_ptr.hbm [resolvable:$true] %s76_s14 }
   0x6   :  { %v25_v2 = vmax.f32 %v23_v0, -100.0  ;;  %v26_v3 = vmax.f32 %v24_v1, -100.0  ;;  %s74_s11 = sshll.u32 %s149_s0, 4  ;;  %s75_s11 = int_to_ptr.vmem [resolvable:$true] %s74_s11 }
   0x8   :  { %v27_v4 = vmin.f32 %v25_v2, 1e+10  ;;  %v28_v5 = vmin.f32 %v26_v3, 1e+10 }
   0xa   :  { %v29_v6 = vsub.f32 0.0, %v27_v4  ;;  %v30_v7 = vsub.f32 0.0, %v28_v5 }
   0xc   :  { %v31_v8 = vmul.f32 1.442695, %v29_v6  ;;  %v33_v9 = vmul.f32 1.442695, %v30_v7 }
   0xe   :  { %88 = vpow2.f32 %v31_v8 }
   0xf   :  { %90 = vpow2.f32 %v33_v9 }
  0x14   :  { %v89_v10 = vpop.eup %88 }
  0x15   :  { %v91_v11 = vpop.eup %90  ;;  %v35_v12 = vadd.f32 1.0, %v89_v10 }
  0x16   :  { %v36_v13 = vadd.f32 1.0, %v91_v11 }
  0x17   :  { %92 = vrcp.f32 %v35_v12  ;;  %vm42_vm0 = vweird.f32 %v35_v12  ;;  %v48_v17 = vand.u32 2147483648, %v35_v12  ;;  %v46_v20 = vand.u32 2147483647, %v35_v12 }
  0x18   :  { %94 = vrcp.f32 %v36_v13  ;;  %v63_v21 = vand.u32 2147483648, %v36_v13  ;;  %vm57_vm2 = vweird.f32 %v36_v13  ;;  %v61_v23 = vand.u32 2147483647, %v36_v13 }
  0x19   :  { %v49_v25 = vor.u32 1.1754944e-38, %v48_v17  ;;  %vm47_vm5 = vcmp.eq.f32.partialorder %v46_v20, 8.507059e+37 }
  0x1a   :  { %v64_v28 = vor.u32 1.1754944e-38, %v63_v21  ;;  %vm62_vm7 = vcmp.eq.f32.partialorder %v61_v23, 8.507059e+37 }
  0x1d   :  { %v93_v14 = vpop.eup %92 }
  0x1e   :  { %v95_v15 = vpop.eup %94  ;;  %v38_v16 = vmul.f32 %v93_v14, %v35_v12  ;;  %vm43_vm1 = vweird.f32 %v93_v14 }
  0x1f   :  { %v53_v18 = vmul.f32 %v95_v15, %v36_v13  ;;  %vm58_vm3 = vweird.f32 %v95_v15  ;;  %vm44_vm4 = vmor %vm42_vm0, %vm43_vm1 }
  0x20   :  { %v39_v19 = vsub.f32 1.0, %v38_v16  ;;  %vm59_vm6 = vmor %vm57_vm2, %vm58_vm3 }
  0x21   :  { %v54_v22 = vsub.f32 1.0, %v53_v18 }
  0x22   :  { %v40_v24 = vmul.f32 %v93_v14, %v39_v19 }
  0x23   :  { %v55_v26 = vmul.f32 %v95_v15, %v54_v22 }
  0x24   :  { %v41_v27 = vadd.f32 %v93_v14, %v40_v24 }
  0x25   :  { %v56_v29 = vadd.f32 %v95_v15, %v55_v26 }
  0x26   :  { %v45_v30 = vsel %vm44_vm4, %v93_v14, %v41_v27 }
  0x27   :  { %v50_v31 = vsel %vm47_vm5, %v49_v25, %v45_v30  ;;  %v60_v32 = vsel %vm59_vm6, %v95_v15, %v56_v29 }
  0x28   :  { %67 = vst [vmem:[#allocation5] sm:$0xff] %v50_v31  ;;  %v65_v33 = vsel %vm62_vm7, %v64_v28, %v60_v32 }
  0x29   :  { %68 = vst [vmem:[#allocation5 + $0x8] sm:$0xff] %v65_v33 }
  0x2a   :  { %79 = dma.vmem_to_hbm [thread:$0]  %s75_s11, 256, %s77_s14, [#allocation4]  }
  0x2b   :  { %146 = dma.done.wait [#allocation4], 256  }
  0x2c   :  { %147 = vsyncadd [#allocation4], 4294967040 }
  0x2d   :  { %84 = vsyncpa [#allocation3], 1 }
  0x2e   :  { %85 = vsyncpa [#allocation4], 1 }

</bundles_post_ra>
